<compile_context>
chip_gen: v7x
topology: tpu7x:2x2x1
jax: 0.10.0
libtpu: 0.0.40
codegen_flags: <defaults>
</compile_context>

<pallas_src>
import functools

import jax
import jax.numpy as jnp
from jax import lax
from jax.experimental import pallas as pl
from jax.experimental.pallas import tpu as pltpu


def _attn_kernel(x_ref, wq_ref, wk_ref, wv_ref, bias_ref, ctx_ref):
    """One (batch, head) grid point: per-head QKV projection + bias-augmented
    causal softmax attention.  Only this head's (N, N) score tile is live."""
    f32 = jnp.float32
    bf16 = jnp.bfloat16

    x = x_ref[0]                                               # (N, DIM) bf16

    # Per-head projections; contraction over the full model dim.
    # 1/sqrt(head_dim) is already folded into Wq host-side.
    q = jnp.dot(x, wq_ref[0], preferred_element_type=f32).astype(bf16)  # (N, D)
    k = jnp.dot(x, wk_ref[0], preferred_element_type=f32).astype(bf16)  # (N, D)
    v = jnp.dot(x, wv_ref[0], preferred_element_type=f32).astype(bf16)  # (N, D)

    # scores[i, j] = q[i] . k[j]   (+ precombined relative bias; bf16 stream,
    # f32 add).
    s = lax.dot_general(q, k, (((1,), (1,)), ((), ())),
                        preferred_element_type=f32)            # (N, N) f32
    s = s + bias_ref[0, 0].astype(f32)

    # Causal mask (large-but-finite fill is safe under max-subtract: the
    # diagonal is never masked, so no row is fully masked).
    n = s.shape[0]
    ii = lax.broadcasted_iota(jnp.int32, (n, n), 0)
    jj = lax.broadcasted_iota(jnp.int32, (n, n), 1)
    s = jnp.where(jj > ii, -1e30, s)

    # Softmax over keys in f32; EUP approx reciprocal for normalization.
    m = jnp.max(s, axis=-1, keepdims=True)
    e = jnp.exp(s - m)
    denom = jnp.sum(e, axis=-1, keepdims=True)
    attn = e * pl.reciprocal(denom, approx=True)
    # TODO(synk): attention dropout is identity at eval time.

    ctx_ref[0, 0] = jnp.dot(attn.astype(bf16), v,
                            preferred_element_type=f32).astype(ctx_ref.dtype)


def _out_proj_kernel(ctx_ref, wo_ref, o_ref, *, heads):
    """out[b] = concat_h(ctx[b, h]) @ Wo, computed as a sum of per-head
    (N, D) @ (D, DIM) partials accumulated in f32 (no in-kernel transpose /
    reshape of the head-major ctx layout)."""
    f32 = jnp.float32
    acc = jnp.dot(ctx_ref[0, 0], wo_ref[0], preferred_element_type=f32)
    for h in range(1, heads):
        acc = acc + jnp.dot(ctx_ref[0, h], wo_ref[h],
                            preferred_element_type=f32)
    o_ref[0] = acc.astype(o_ref.dtype)


def simple_relative_structure_attention(x, params, rel_structure_matrix, *,
                                        heads, max_seq_len, alpha=1.0,
                                        rel_time=True, rel_pitch=True):
    """Pallas implementation of SimpleRelativeStructureAttention.forward
    (cache=None, return_cached_kv=False path).  Returns (out, None)."""
    B, N, DIM = x.shape
    D = DIM // heads
    f32 = jnp.float32
    bf16 = jnp.bfloat16

    # ---- host-side glue: combine all relative biases into (B, H, N, N) ----
    i_pos = jnp.arange(N)[:, None]
    j_pos = jnp.arange(N)[None, :]
    rel_pos = jnp.clip(i_pos - j_pos, 0, max_seq_len - 1)             # (N, N)
    srel = jnp.transpose(params['rel_idx_emb'][rel_pos], (2, 0, 1))   # (H,N,N)
    bias = jnp.broadcast_to(srel[None], (B, heads, N, N))
    if rel_time:
        s_bar = jnp.transpose(
            params['rel_bar_emb'][rel_structure_matrix['bar'] + 1], (0, 3, 1, 2))
        s_position = jnp.transpose(
            params['rel_position_emb'][rel_structure_matrix['position'] + 1],
            (0, 3, 1, 2))
        bias = bias + s_bar + s_position
    if rel_pitch:
        s_octave = jnp.transpose(
            params['rel_octave_emb'][rel_structure_matrix['octave'] + 1],
            (0, 3, 1, 2))
        s_semitone = jnp.transpose(
            params['rel_semitone_emb'][rel_structure_matrix['semitone'] + 1],
            (0, 3, 1, 2))
        bias = bias + s_octave + s_semitone

    scale = 1.0 / (D ** 0.5)
    # bf16 bias stream: halves the dominant HBM read; the kernel adds it in f32.
    bias = (bias * (alpha * scale)).astype(bf16)

    # bf16 MXU operands (f32 accumulation).  Head-major weight layouts so every
    # BlockSpec keeps full (second-minor, minor) dims.
    x_bf = x.astype(bf16)
    wq_r = (params['wq'] * scale).astype(bf16).reshape(DIM, heads, D).transpose(1, 0, 2)
    wk_r = params['wk'].astype(bf16).reshape(DIM, heads, D).transpose(1, 0, 2)
    wv_r = params['wv'].astype(bf16).reshape(DIM, heads, D).transpose(1, 0, 2)
    wo_r = params['wo'].astype(bf16).reshape(heads, D, DIM)

    # ---- kernel 1: per-(batch, head) attention -> ctx (B, H, N, D) bf16 ----
    ctx = pl.pallas_call(
        _attn_kernel,
        out_shape=jax.ShapeDtypeStruct((B, heads, N, D), bf16),
        grid=(B, heads),
        in_specs=[
            pl.BlockSpec((1, N, DIM), lambda b, h: (b, 0, 0)),      # x (stays resident across h)
            pl.BlockSpec((1, DIM, D), lambda b, h: (h, 0, 0)),      # Wq head slice
            pl.BlockSpec((1, DIM, D), lambda b, h: (h, 0, 0)),      # Wk head slice
            pl.BlockSpec((1, DIM, D), lambda b, h: (h, 0, 0)),      # Wv head slice
            pl.BlockSpec((1, 1, N, N), lambda b, h: (b, h, 0, 0)),  # bias tile (bf16)
        ],
        out_specs=pl.BlockSpec((1, 1, N, D), lambda b, h: (b, h, 0, 0)),
        compiler_params=pltpu.CompilerParams(
            dimension_semantics=("parallel", "parallel")),
    )(x_bf, wq_r, wk_r, wv_r, bias)

    # ---- kernel 2: output projection out = concat_h(ctx_h) @ Wo ----
    out = pl.pallas_call(
        functools.partial(_out_proj_kernel, heads=heads),
        out_shape=jax.ShapeDtypeStruct((B, N, DIM), f32),
        grid=(B,),
        in_specs=[
            pl.BlockSpec((1, heads, N, D), lambda b: (b, 0, 0, 0)),  # ctx
            pl.BlockSpec((heads, D, DIM), lambda b: (0, 0, 0)),      # Wo (resident)
        ],
        out_specs=pl.BlockSpec((1, N, DIM), lambda b: (b, 0, 0)),
        compiler_params=pltpu.CompilerParams(
            dimension_semantics=("parallel",)),
    )(ctx, wo_r)

    # TODO(synk): cache / return_cached_kv (incremental decoding) path not implemented.
    return out, None


def reference_forward(x, params, rel_structure_matrix, *, heads, max_seq_len,
                      alpha=1.0, rel_time=True, rel_pitch=True):
    """Pure-JAX f32 mirror of the PyTorch forward (cache=None), for verification."""
    B, N, DIM = x.shape
    D = DIM // heads

    def split(y):
        return y.reshape(B, N, heads, D).transpose(0, 2, 1, 3)

    q = split(x @ params['wq'])
    k = split(x @ params['wk'])
    v = split(x @ params['wv'])
    qk = jnp.einsum('bhid,bhjd->bhij', q, k)

    i_pos = jnp.arange(N)[:, None]
    j_pos = jnp.arange(N)[None, :]
    rel_pos = jnp.clip(i_pos - j_pos, 0, max_seq_len - 1)
    srel = jnp.transpose(params['rel_idx_emb'][rel_pos], (2, 0, 1))[None]
    s_time = 0.0
    s_pitch = 0.0
    if rel_time:
        s_bar = jnp.transpose(
            params['rel_bar_emb'][rel_structure_matrix['bar'] + 1], (0, 3, 1, 2))
        s_position = jnp.transpose(
            params['rel_position_emb'][rel_structure_matrix['position'] + 1],
            (0, 3, 1, 2))
        s_time = s_bar + s_position
    if rel_pitch:
        s_octave = jnp.transpose(
            params['rel_octave_emb'][rel_structure_matrix['octave'] + 1],
            (0, 3, 1, 2))
        s_semitone = jnp.transpose(
            params['rel_semitone_emb'][rel_structure_matrix['semitone'] + 1],
            (0, 3, 1, 2))
        s_pitch = s_octave + s_semitone

    dots = (qk + alpha * (srel + s_time + s_pitch)) / (D ** 0.5)
    mask = jnp.triu(jnp.ones((N, N), dtype=bool), 1)
    dots = jnp.where(mask, -jnp.finfo(dots.dtype).max, dots)
    attn = jax.nn.softmax(dots, axis=-1)
    out = jnp.einsum('bhij,bhjd->bhid', attn, v)
    out = out.transpose(0, 2, 1, 3).reshape(B, N, DIM)
    return out @ params['wo']


if __name__ == "__main__":
    B, N, DIM, HEADS, MAX_SEQ_LEN = 2, 8, 32, 4, 16
    D = DIM // HEADS
    ALPHA = 1.0

    key = jax.random.PRNGKey(0)
    ks = jax.random.split(key, 14)
    scale = 1.0 / (DIM ** 0.5)

    x = jax.random.normal(ks[0], (B, N, DIM), jnp.float32)
    params = {
        'wq': jax.random.normal(ks[1], (DIM, DIM), jnp.float32) * scale,
        'wk': jax.random.normal(ks[2], (DIM, DIM), jnp.float32) * scale,
        'wv': jax.random.normal(ks[3], (DIM, DIM), jnp.float32) * scale,
        'wo': jax.random.normal(ks[4], (DIM, DIM), jnp.float32) * scale,
        'rel_idx_emb': jax.random.normal(ks[5], (MAX_SEQ_LEN, HEADS), jnp.float32) * 0.1,
        # padding_idx=0 embeddings: row 0 is zero.
        'rel_bar_emb': (jax.random.normal(ks[6], (17, HEADS), jnp.float32) * 0.1).at[0].set(0.0),
        'rel_position_emb': (jax.random.normal(ks[7], (96, HEADS), jnp.float32) * 0.1).at[0].set(0.0),
        'rel_octave_emb': (jax.random.normal(ks[8], (25, HEADS), jnp.float32) * 0.1).at[0].set(0.0),
        'rel_semitone_emb': (jax.random.normal(ks[9], (13, HEADS), jnp.float32) * 0.1).at[0].set(0.0),
    }
    rel_structure_matrix = {
        'bar': jax.random.randint(ks[10], (B, N, N), -1, 16),
        'position': jax.random.randint(ks[11], (B, N, N), -1, 95),
        'octave': jax.random.randint(ks[12], (B, N, N), -1, 24),
        'semitone': jax.random.randint(ks[13], (B, N, N), -1, 12),
    }

    out, cached = simple_relative_structure_attention(
        x, params, rel_structure_matrix,
        heads=HEADS, max_seq_len=MAX_SEQ_LEN, alpha=ALPHA,
        rel_time=True, rel_pitch=True)
    out = jax.block_until_ready(out)

    ref = reference_forward(
        x, params, rel_structure_matrix,
        heads=HEADS, max_seq_len=MAX_SEQ_LEN, alpha=ALPHA,
        rel_time=True, rel_pitch=True)
    ref = jax.block_until_ready(ref)

    max_err = float(jnp.max(jnp.abs(out - ref)))
    assert out.shape == (B, N, DIM)
    assert cached is None
    # Kernel uses bf16 MXU operands / bf16 bias (f32 accumulation) + approx
    # reciprocal; compare against the pure-f32 reference at bf16 tolerance.
    assert max_err < 5e-2, f"mismatch vs reference, max abs err = {max_err}"
    print("KERNEL_OK")
</pallas_src>

<mosaic_0001>
module attributes {stable_mosaic.version = 11 : i64} {
  func.func @_attn_kernel(%arg0: i32, %arg1: i32, %arg2: memref<1x8x32xbf16, #tpu.memory_space<vmem>>, %arg3: memref<1x32x8xbf16, #tpu.memory_space<vmem>>, %arg4: memref<1x32x8xbf16, #tpu.memory_space<vmem>>, %arg5: memref<1x32x8xbf16, #tpu.memory_space<vmem>>, %arg6: memref<1x1x8x8xbf16, #tpu.memory_space<vmem>>, %arg7: memref<1x1x8x8xbf16, #tpu.memory_space<vmem>>) attributes {dimension_semantics = [#tpu.dimension_semantics<parallel>, #tpu.dimension_semantics<parallel>], iteration_bounds = array<i64: 2, 4>, scalar_prefetch = 0 : i64, scratch_operands = 0 : i64, tpu.core_type = #tpu.core_type<tc>, window_params = [{transform_indices = @transform_0, window_bounds = array<i64: 1, 8, 32>}, {transform_indices = @transform_1, window_bounds = array<i64: 1, 32, 8>}, {transform_indices = @transform_2, window_bounds = array<i64: 1, 32, 8>}, {transform_indices = @transform_3, window_bounds = array<i64: 1, 32, 8>}, {transform_indices = @transform_4, window_bounds = array<i64: 1, 1, 8, 8>}, {transform_indices = @transform_5, window_bounds = array<i64: 1, 1, 8, 8>}]} {
    %c0 = arith.constant 0 : index
    %c0_0 = arith.constant 0 : index
    %c0_1 = arith.constant 0 : index
    %0 = vector.load %arg2[%c0, %c0_0, %c0_1] : memref<1x8x32xbf16, #tpu.memory_space<vmem>>, vector<1x8x32xbf16>
    %1 = vector.shape_cast %0 : vector<1x8x32xbf16> to vector<8x32xbf16>
    %c0_2 = arith.constant 0 : index
    %c0_3 = arith.constant 0 : index
    %c0_4 = arith.constant 0 : index
    %2 = vector.load %arg3[%c0_2, %c0_3, %c0_4] : memref<1x32x8xbf16, #tpu.memory_space<vmem>>, vector<1x32x8xbf16>
    %3 = vector.shape_cast %2 : vector<1x32x8xbf16> to vector<32x8xbf16>
    %cst = arith.constant dense<0.000000e+00> : vector<8x8xf32>
    %4 = tpu.matmul %1, %3, %cst {dimension_numbers = #tpu.dot_dimension_numbers<[1], [0], [0], [1], [0, 0, 1, 1], [], []>} : vector<8x32xbf16>, vector<32x8xbf16>, vector<8x8xf32> -> vector<8x8xf32>
    %5 = arith.truncf %4 : vector<8x8xf32> to vector<8x8xbf16>
    %c0_5 = arith.constant 0 : index
    %c0_6 = arith.constant 0 : index
    %c0_7 = arith.constant 0 : index
    %6 = vector.load %arg4[%c0_5, %c0_6, %c0_7] : memref<1x32x8xbf16, #tpu.memory_space<vmem>>, vector<1x32x8xbf16>
    %7 = vector.shape_cast %6 : vector<1x32x8xbf16> to vector<32x8xbf16>
    %cst_8 = arith.constant dense<0.000000e+00> : vector<8x8xf32>
    %8 = tpu.matmul %1, %7, %cst_8 {dimension_numbers = #tpu.dot_dimension_numbers<[1], [0], [0], [1], [0, 0, 1, 1], [], []>} : vector<8x32xbf16>, vector<32x8xbf16>, vector<8x8xf32> -> vector<8x8xf32>
    %9 = arith.truncf %8 : vector<8x8xf32> to vector<8x8xbf16>
    %c0_9 = arith.constant 0 : index
    %c0_10 = arith.constant 0 : index
    %c0_11 = arith.constant 0 : index
    %10 = vector.load %arg5[%c0_9, %c0_10, %c0_11] : memref<1x32x8xbf16, #tpu.memory_space<vmem>>, vector<1x32x8xbf16>
    %11 = vector.shape_cast %10 : vector<1x32x8xbf16> to vector<32x8xbf16>
    %cst_12 = arith.constant dense<0.000000e+00> : vector<8x8xf32>
    %12 = tpu.matmul %1, %11, %cst_12 {dimension_numbers = #tpu.dot_dimension_numbers<[1], [0], [0], [1], [0, 0, 1, 1], [], []>} : vector<8x32xbf16>, vector<32x8xbf16>, vector<8x8xf32> -> vector<8x8xf32>
    %13 = arith.truncf %12 : vector<8x8xf32> to vector<8x8xbf16>
    %cst_13 = arith.constant dense<0.000000e+00> : vector<8x8xf32>
    %14 = tpu.matmul %5, %9, %cst_13 {dimension_numbers = #tpu.dot_dimension_numbers<[1], [1], [0], [0], [0, 0, 1, 0], [], []>} : vector<8x8xbf16>, vector<8x8xbf16>, vector<8x8xf32> -> vector<8x8xf32>
    %c0_14 = arith.constant 0 : index
    %c0_15 = arith.constant 0 : index
    %c0_16 = arith.constant 0 : index
    %c0_17 = arith.constant 0 : index
    %15 = vector.load %arg6[%c0_14, %c0_15, %c0_16, %c0_17] : memref<1x1x8x8xbf16, #tpu.memory_space<vmem>>, vector<1x1x8x8xbf16>
    %16 = vector.shape_cast %15 : vector<1x1x8x8xbf16> to vector<8x8xbf16>
    %17 = arith.extf %16 : vector<8x8xbf16> to vector<8x8xf32>
    %18 = arith.addf %14, %17 : vector<8x8xf32>
    %19 = tpu.iota {dimensions = array<i32: 0>} : vector<8x8xi32>
    %20 = tpu.iota {dimensions = array<i32: 1>} : vector<8x8xi32>
    %21 = arith.cmpi sgt, %20, %19 : vector<8x8xi32>
    %cst_18 = arith.constant -1.000000e+30 : f32
    %22 = vector.broadcast %cst_18 : f32 to vector<8x8xf32>
    %23 = arith.select %21, %22, %18 : vector<8x8xi1>, vector<8x8xf32>
    %cst_19 = arith.constant dense<0xFF800000> : vector<8xf32>
    %24 = vector.multi_reduction <maximumf>, %23, %cst_19 [1] : vector<8x8xf32> to vector<8xf32>
    %25 = vector.shape_cast %24 : vector<8xf32> to vector<8x1xf32>
    %26 = vector.broadcast %25 : vector<8x1xf32> to vector<8x8xf32>
    %27 = arith.subf %23, %26 : vector<8x8xf32>
    %28 = math.exp %27 : vector<8x8xf32>
    %cst_20 = arith.constant dense<0.000000e+00> : vector<8xf32>
    %29 = vector.multi_reduction <add>, %28, %cst_20 [1] : vector<8x8xf32> to vector<8xf32>
    %30 = vector.shape_cast %29 : vector<8xf32> to vector<8x1xf32>
    %31 = tpu.reciprocal %30 {approx = true} : vector<8x1xf32> -> vector<8x1xf32>
    %32 = vector.broadcast %31 : vector<8x1xf32> to vector<8x8xf32>
    %33 = arith.mulf %28, %32 : vector<8x8xf32>
    %34 = arith.truncf %33 : vector<8x8xf32> to vector<8x8xbf16>
    %cst_21 = arith.constant dense<0.000000e+00> : vector<8x8xf32>
    %35 = tpu.matmul %34, %13, %cst_21 {dimension_numbers = #tpu.dot_dimension_numbers<[1], [0], [0], [1], [0, 0, 1, 1], [], []>} : vector<8x8xbf16>, vector<8x8xbf16>, vector<8x8xf32> -> vector<8x8xf32>
    %36 = arith.truncf %35 : vector<8x8xf32> to vector<8x8xbf16>
    %c0_22 = arith.constant 0 : index
    %c0_23 = arith.constant 0 : index
    %c0_24 = arith.constant 0 : index
    %c0_25 = arith.constant 0 : index
    %37 = vector.load %arg7[%c0_22, %c0_23, %c0_24, %c0_25] : memref<1x1x8x8xbf16, #tpu.memory_space<vmem>>, vector<1x1x8x8xbf16>
    %38 = vector.shape_cast %37 : vector<1x1x8x8xbf16> to vector<8x8xbf16>
    %39 = vector.shape_cast %36 : vector<8x8xbf16> to vector<1x1x8x8xbf16>
    tpu.vector_store %arg7[%c0_22, %c0_23, %c0_24, %c0_25], %39 {strides = array<i32>} : memref<1x1x8x8xbf16, #tpu.memory_space<vmem>>, vector<1x1x8x8xbf16>,
    return
  }
  func.func @transform_0(%arg0: i32, %arg1: i32) -> (i32, i32, i32) {
    %c0_i32 = arith.constant 0 : i32
    %c0_i32_0 = arith.constant 0 : i32
    %c0_i32_1 = arith.constant 0 : i32
    return %arg0, %c0_i32, %c0_i32_0 : i32, i32, i32
  }
  func.func @transform_1(%arg0: i32, %arg1: i32) -> (i32, i32, i32) {
    %c0_i32 = arith.constant 0 : i32
    %c0_i32_0 = arith.constant 0 : i32
    %c0_i32_1 = arith.constant 0 : i32
    return %arg1, %c0_i32, %c0_i32_0 : i32, i32, i32
  }
  func.func @transform_2(%arg0: i32, %arg1: i32) -> (i32, i32, i32) {
    %c0_i32 = arith.constant 0 : i32
    %c0_i32_0 = arith.constant 0 : i32
    %c0_i32_1 = arith.constant 0 : i32
    return %arg1, %c0_i32, %c0_i32_0 : i32, i32, i32
  }
  func.func @transform_3(%arg0: i32, %arg1: i32) -> (i32, i32, i32) {
    %c0_i32 = arith.constant 0 : i32
    %c0_i32_0 = arith.constant 0 : i32
    %c0_i32_1 = arith.constant 0 : i32
    return %arg1, %c0_i32, %c0_i32_0 : i32, i32, i32
  }
  func.func @transform_4(%arg0: i32, %arg1: i32) -> (i32, i32, i32, i32) {
    %c0_i32 = arith.constant 0 : i32
    %c0_i32_0 = arith.constant 0 : i32
    %c0_i32_1 = arith.constant 0 : i32
    return %arg0, %arg1, %c0_i32, %c0_i32_0 : i32, i32, i32, i32
  }
  func.func @transform_5(%arg0: i32, %arg1: i32) -> (i32, i32, i32, i32) {
    %c0_i32 = arith.constant 0 : i32
    %c0_i32_0 = arith.constant 0 : i32
    %c0_i32_1 = arith.constant 0 : i32
    return %arg0, %arg1, %c0_i32, %c0_i32_0 : i32, i32, i32, i32
  }
}

</mosaic_0001>

<bundles_post_ra>
// kernel: tpu_custom_call.1
= control target key start
LH: loop header
LB: loop body
LE: loop exit
PB: predicated region body
PF: predicated region fallthrough
CT: control target
= control target key end

     0   :  { %10 = vsyncpa [#allocation3], 0  ;;  %s1233_s0 = inlined_call_operand.vmem [shape: bf16[2,8,32], index: 0, kind: input, shape index: {}]   ;;  %s1234_s1 = inlined_call_operand.vmem [shape: bf16[4,32,8], index: 1, kind: input, shape index: {}]   ;;  %s1235_s2 = inlined_call_operand.vmem [shape: bf16[4,32,8], index: 2, kind: input, shape index: {}]   ;;  %s1236_s3 = inlined_call_operand.vmem [shape: bf16[4,32,8], index: 3, kind: input, shape index: {}]   ;;  %s1237_s4 = inlined_call_operand.vmem [shape: bf16[2,4,8,8], index: 4, kind: input, shape index: {}]   ;;  %s1238_s5 = inlined_call_operand.hbm [shape: bf16[2,4,8,8], index: 5, kind: output, shape index: {}]  }
   0x1   :  { %12 = vsyncpa [#allocation3 + $0x1], 0  ;;  %s1056_s18 = smov 0   ;;  %s1058_s19 = smov 0  }
   0x2   :  { %s1060_s20 = smov 0   ;;  %s1062_s21 = smov 0  }
   0x3   :  { %s1064_s22 = smov 0   ;;  %s1066_s23 = smov 0  }
   0x4   :  { %s1068_s24 = smov 0   ;;  %s1070_s25 = smov 0  }
   0x5 LB: > { %1242 = sst [smem:[#allocation5_spill]] %s1017_s24  ;;  %s761_s26 = sadd.s32 4294967295, %s1021_s25   ;;  %s1021_s25 = sphi %s1070_s25, %s18_s25   ;;  %s1017_s24 = sphi %s1068_s24, %s1249_s24   ;;  %s1013_s23 = sphi %s1066_s23, %s1254_s23   ;;  %s1009_s22 = sphi %s1064_s22, %s1247_s22   ;;  %s1005_s21 = sphi %s1062_s21, %s1253_s21   ;;  %s1001_s20 = sphi %s1060_s20, %s1252_s20   ;;  %s997_s19 = sphi %s1058_s19, %s1251_s19   ;;  %s993_s18 = sphi %s1056_s18, %s1250_s18  }
   0x6   : > { %s762_s27 = sadd.s32 4294967294, %s1021_s25   ;;  %s27_s28 = sadd.s32 1, %s1013_s23 }
   0x7   : > { %p28_p0 = scmp.ge.s32.totalorder %s27_s28, 4  ;;  %s30_s29 = sadd.s32 1, %s1017_s24 }
   0x8   : > { %p181_p1 = scmp.ne.s32.totalorder %s1001_s20, %s997_s19  ;;  %p182_p2 = scmp.eq.s32.totalorder %s761_s26, 7 }
   0x9   : > { %s1256_s28 = smov (%p28_p0, %s27_s28), 0  ;;  %s1258_s29 = smov (!%p28_p0, %s30_s29), %s1017_s24 }
   0xa   : > { %1243 = sst [smem:[#allocation6_spill]] %s1256_s28  ;;  %s167_s30 = ssub.s32 %s1013_s23, %s1256_s28 }
   0xb   : > { %p1107_p3 = por %p182_p2, %p181_p1  ;;  %p32_p4 = scmp.ge.s32.totalorder %s1258_s29, 2 }
   0xc   : > { %p187_p5 = scmp.ne.s32.totalorder %s997_s19, %s993_s18  ;;  %p188_p6 = scmp.eq.s32.totalorder %s762_s27, 7 }
   0xd   : > { %p765_p7 = scmp.ge.s32.totalorder %s1021_s25, 1  ;;  %s1260_s29 = smov (%p32_p4, %s1258_s29), 0 }
   0xe   : > { %1245 = sst [smem:[#allocation7_spill]] %s1260_s29  ;;  %p1116_p8 = por %p188_p6, %p187_p5 }
   0xf   : > { %p248_p9 = scmp.lt.s32.totalorder %s1021_s25, 9  ;;  %s166_s8 = ssub.s32 %s1017_s24, %s1260_s29 }
  0x10   : > { %s171_s9 = sadd.s32 1, %s1001_s20  ;;  %s168_s10 = sor.u32 %s167_s30, %s166_s8 }
  0x11   : > { %p249_p10 = pnand %p765_p7, %p248_p9  ;;  %p169_p11 = scmp.eq.s32.totalorder %s168_s10, 0 }
  0x12   : > { %p302_p12 = scmp.lt.s32.totalorder (!%p249_p10), %s1005_s21, 3  ;;  %p298_p13 = scmp.lt.s32.totalorder (!%p249_p10), %s1009_s22, 1  ;;  %v1023_v0 = vmov (!%p249_p10), 0.0   ;;  %vm1024_vm0 = vmmov (!%p249_p10), 0   ;;  %vm343_vm1 = vcmask (!%p249_p10), 261120   ;;  %vm504_vm2 = vcmask (!%p249_p10), 64512  }
  0x13   : > { %s1125_s11 = scalar_select %p169_p11, %s1001_s20, %s171_s9  }
  0x14   : > { %252 = sbr.rel (%p249_p10) target bundleno = 1020 (0x3fc), region = 40  ;;  %816 = vmatprep.subr.bf16.mxu1 (!%p249_p10), %v1023_v0  ;;  %808 = vmatprep.subr.bf16.mxu0 (!%p249_p10), %v1023_v0  ;;  %v551_v19 = vlaneseq (!%p249_p10)  ;;  %vm572_vm4 = vcmask (!%p249_p10), 1043456   ;;  %vm617_vm5 = vcmask (!%p249_p10), 60416  }
  0x15   : > { %820 = vmatprep.mubr.msk.bf16.mxu1 (!%p249_p10), %vm1024_vm0, %v1023_v0  ;;  %812 = vmatprep.mubr.msk.bf16.mxu0 (!%p249_p10), %vm1024_vm0, %v1023_v0 }
  0x16   : > { %v552_v21 = vshrl.u32 (!%p249_p10), %v551_v19, 7  ;;  %v554_v22 = vand.u32 (!%p249_p10), 127, %v551_v19 }
  0x18   : > { %vm555_vm3 = vcmp.gt.s32.totalorder (!%p249_p10), %v554_v22, %v552_v21 }
  0x1b   : > { %s1130_s12 = scalar_select %p302_p12, %s1005_s21, 3 }
  0x1c   : > { %s1135_s13 = scalar_select %p298_p13, %s1009_s22, 1 }
  0x1d   : > { %s792_s14 = sshll.u32 %s1130_s12, 4 }
  0x1e   : > { %s311_s17 = scalar_lea.vmem %s1235_s2, %s792_s14  ;;  %s306_s30 = scalar_lea.vmem %s1234_s1, %s792_s14 }
  0x1f   : > { %v917_v1 = vld [vmem:[%s311_s17] sm:$0xff]   ;;  %s767_s8 = sshll.u32 %s1135_s13, 2  ;;  %v918_v2 = vld [vmem:[%s311_s17 + $0x8] sm:$0xff]   ;;  %s1148_s29 = scalar_lea.vmem %s1236_s3, %s792_s14 }
  0x20   : > { %817 = vmatpush3.bf16.msra.mxu1 %v917_v1  ;;  %v919_v3 = vld [vmem:[%s306_s30] sm:$0xff]   ;;  %s301_s15 = scalar_lea.vmem %s1233_s0, %s767_s8  ;;  %v920_v4 = vld [vmem:[%s306_s30 + $0x8] sm:$0xff]   ;;  %s322_s24 = sadd.s32 %s767_s8, %s1130_s12 }
  0x21   : > { %818 = vmatprep.subr.bf16.mxu1 %v1023_v0  ;;  %809 = vmatpush3.bf16.msra.mxu0 %v919_v3  ;;  %v326_v5 = vld [vmem:[%s301_s15] sm:$0xf]  ;;  %v922_v18 = vld [vmem:[%s1148_s29 + $0x8] sm:$0xff]   ;;  %s775_s28 = sshll.u32 %s322_s24, 2  ;;  %s788_s13 = sshll.u32 %s1009_s22, 2 }
  0x22   : > { %810 = vmatprep.subr.bf16.mxu0 %v1023_v0  ;;  %v921_v17 = vld [vmem:[%s1148_s29] sm:$0xff]   ;;  %s324_s17 = scalar_lea.vmem %s1237_s4, %s775_s28  ;;  %s295_s29 = sand.u32 1, %s997_s19  }
  0x23   : > { %v502_v20 = vld [vmem:[%s324_s17] sm:$0xf]  ;;  %s766_s12 = sshll.u32 %s295_s29, 2  ;;  %s631_s26 = sadd.s32 %s1005_s21, %s788_s13 }
  0x24   : > { %819 = vmatpush3.bf16.msra.mxu1 %v918_v2  ;;  %v503_v23 = vunpack.c.l.bf16 %v502_v20  ;;  %s789_s27 = sshll.u32 %s631_s26, 6  ;;  %s297_s30 = scalar_lea.vmem [#allocation2], %s766_s12 }
  0x25   : > { %832 = vmatprep.subr.bf16.mxu1 %v1023_v0  ;;  %811 = vmatpush3.bf16.msra.mxu0 %v920_v4  ;;  %s635_s8 = sshll.u32 %s297_s30, 4  ;;  %s1180_s15 = scalar_lea.hbm %s1238_s5, %s789_s27  ;;  %s1182_s8 = int_to_ptr.vmem [resolvable:$true] %s635_s8 }
  0x26   : > { %824 = vmatprep.subr.bf16.mxu0 %v1023_v0  ;;  %s620_s21 = scalar_lea.sflag [#allocation3], %s295_s29  ;;  %s927_s22 = scalar_lea.vmem %s1182_s8, 64 }
  0x27   : > { %821 = vmatmul.mubr.msk.bf16.vlgmr.msra.gmra.mrb[0].mxu1 %vm343_vm1, %v326_v5  ;;  %p928_p0 = scmp.ne.s32.totalorder %s1182_s8, %s927_s22  ;;  %s1025_s24 = smov [#allocation2]  }
  0x28   : > { %834 = vmatprep.mubr.msk.bf16.mxu1 %vm1024_vm0, %v1023_v0  ;;  %813 = vmatmul.mubr.msk.bf16.vlgmr.msra.gmra.mrb[0].mxu0 %vm343_vm1, %v326_v5  ;;  %s931_s28 = sshll.u32 %s1025_s24, 4  ;;  %s932_s28 = int_to_ptr.vmem [resolvable:$false] %s931_s28 }
  0x29   : > { %828 = vmatprep.mubr.msk.bf16.mxu0 %vm1024_vm0, %v1023_v0  ;;  %825 = vmatpush3.bf16.msra.mxu0 %v921_v17  ;;  %p929_p1 = pnand %p928_p0, %p1107_p3  ;;  %s933_s14 = scalar_lea.vmem %s932_s28, 128 }
  0x2a   : > { %826 = vmatprep.subr.bf16.mxu0 %v1023_v0  ;;  %p934_p4 = scmp.lt.s32.totalorder %s1182_s8, %s932_s28  ;;  %p935_p5 = scmp.lt.s32.totalorder %s933_s14, %s927_s22 }
  0x2b   : > { %p930_p2 = pneg %p929_p1 }
  0x2c   : > { %p936_p6 = por %p935_p5, %p934_p4 }
  0x2d   : > { %827 = vmatpush3.bf16.msra.mxu0 %v922_v18 }
  0x2e   : > { %838 = vmatprep.subr.bf16.mxu0 %v1023_v0  ;;  %p937_p7 = pnand %p936_p6, %p930_p2 }
  0x30   : > { %829 = vmatmul.mubr.msk.bf16.vlgmr.msra.gmra.mrb[4].mxu0 %vm343_vm1, %v326_v5 }
  0x31   : > { %840 = vmatprep.mubr.msk.bf16.mxu0 %vm1024_vm0, %v1023_v0 }
  0xfa   : > { %v438_v6 = vpop.f32.mrb[0].mxu1 }
  0xfb   : > { %v444_v7 = vpack.c.bf16 %v438_v6, %v438_v6  ;;  %v822_v8 = vpop.f32.mrb[1].mxu1  ;;  %v381_v10 = vpop.f32.mrb[0].mxu0 }
  0xfc   : > { %v441_v9 = vpop.f32.mrb[2].mxu1  ;;  %v814_v13 = vpop.f32.mrb[1].mxu0  ;;  %v387_v16 = vpack.c.bf16 %v381_v10, %v381_v10 }
  0xfd   : > { %v509_v11 = vsel %vm504_vm2, %v444_v7, 0  ;;  %v823_v12 = vpop.f32.mrb[3].mxu1  ;;  %v384_v14 = vpop.f32.mrb[2].mxu0 }
  0xfe   : > { %833 = vmatpush3.bf16.xpose.msra.mxu1 %v509_v11  ;;  %v815_v15 = vpop.f32.mrb[3].mxu0 }
 0x103   : > { %v495_v36 = vpop.f32.mrb[4].mxu0 }
 0x104   : > { %v830_v37 = vpop.f32.mrb[5].mxu0  ;;  %v501_v40 = vpack.c.bf16 %v495_v36, %v495_v36 }
 0x105   : > { %835 = vmatmul.mubr.msk.bf16.vlgmr.msra.gmra.mrb[4].mxu1 %vm504_vm2, %v387_v16  ;;  %v498_v38 = vpop.f32.mrb[6].mxu0 }
 0x106   : > { %v831_v39 = vpop.f32.mrb[7].mxu0  ;;  %v574_v41 = vsel %vm572_vm4, %v501_v40, 0 }
 0x107   : > { %839 = vmatpush3.bf16.msra.mxu0 %v574_v41 }
 0x1d8   : > { %v545_v24 = vpop.f32.mrb[4].mxu1 }
 0x1d9   : > { %v546_v25 = vadd.f32 %v545_v24, %v503_v23  ;;  %v836_v26 = vpop.f32.mrb[5].mxu1 }
 0x1da   : > { %v548_v27 = vpop.f32.mrb[6].mxu1 }
 0x1db   : > { %v837_v28 = vpop.f32.mrb[7].mxu1  ;;  %v556_v29 = vsel %vm555_vm3, -1e+30, %v546_v25 }
 0x1dc   : > { %v557_v30 = vsel %vm504_vm2, %v556_v29, -inf }
 0x1dd   : > { %558 = vmax.xlane.f32.xlu0 %v557_v30 }
 0x26a   : > { %v559_v31 = vpop.xlane.xlu0 %558 }
 0x26b   : > { %v560_v32 = vsub.f32 %v556_v29, %v559_v31 }
 0x26d   : > { %v561_v33 = vmul.f32 1.442695, %v560_v32 }
 0x26f   : > { %923 = vpow2.f32 %v561_v33 }
 0x279   : > { %v924_v34 = vpop.eup %923 }
 0x27a   : > { %v563_v35 = vsel %vm504_vm2, %v924_v34, 0.0 }
 0x27b   : > { %564 = vadd.xlane.f32.xlu0 %v563_v35 }
 0x308   : > { %v565_v42 = vpop.xlane.xlu0 %564 }
 0x309   : > { %925 = vrcp.f32 %v565_v42 }
 0x313   : > { %v926_v43 = vpop.eup %925 }
 0x314   : > { %v567_v44 = vmul.f32 %v926_v43, %v924_v34 }
 0x316   : > { %v568_v45 = vpack.c.bf16 %v567_v44, %v567_v44 }
 0x318   : > { %841 = vmatmul.mubr.msk.bf16.vlgmr.msra.gmra.mrb[8].mxu0 %vm504_vm2, %v568_v45 }
 0x3eb   : > { %v610_v46 = vpop.f32.mrb[8].mxu0 }
 0x3ec   : > { %v616_v47 = vpack.c.bf16 %v610_v46, %v610_v46  ;;  %v842_v48 = vpop.f32.mrb[9].mxu0 }
 0x3ed   : > { %v613_v49 = vpop.f32.mrb[10].mxu0 }
 0x3ee   : > { %v843_v50 = vpop.f32.mrb[11].mxu0  ;;  %618 = vst.msk [vmem:[%s297_s30] sm:$0xf] %vm617_vm5, %v616_v47 }
 0x3ef   : > { %940 = shalt.err (!%p937_p7)
}
 0x3f0   : > { %s941_s16 = scalar_lea.hbm %s1180_s15, 64  ;;  %s945_s12 = scalar_lea.hbm %s1238_s5, 512 }
 0x3f1   : > { %p942_p9 = scmp.ne.s32.totalorder %s1180_s15, %s941_s16  ;;  %p946_p12 = scmp.lt.u32.totalorder %s1180_s15, %s1238_s5 }
 0x3f2   : > { %p947_p13 = scmp.lt.u32.totalorder %s945_s12, %s941_s16  ;;  %p949_p1 = scmp.lt.u32.totalorder %s941_s16, %s1180_s15 }
 0x3f3   : > { %p943_p10 = pnand %p942_p9, %p1107_p3 }
 0x3f4   : > { %p948_p0 = por %p947_p13, %p946_p12 }
 0x3f5   : > { %p944_p11 = pneg %p943_p10 }
 0x3f6   : > { %p950_p2 = por %p949_p1, %p948_p0 }
 0x3f8   : > { %p951_p4 = pnand %p950_p2, %p944_p11 }
 0x3fa   : > { %954 = shalt.err (!%p951_p4)
}
 0x3fb   : > { %844 = dma.vmem_to_hbm [thread:$0]  (%p1107_p3), %s1182_s8, 64, %s1180_s15, %s620_s21  }
 0x3fc PF: > { %p850_p5 = scmp.ge.s32.totalorder %s1021_s25, 2  ;;  %s647_s27 = sand.u32 1, %s993_s18  }
 0x3fd   : > { %s648_s30 = scalar_lea.sflag [#allocation3], %s647_s27 }
 0x3fe   : > { %p847_p6 = pnand %p850_p5, %p1116_p8 }
 0x400   : > { %988 = dma.done.wait (!%p847_p6), %s648_s30, 64  }
 0x401   : > { %990 = vsyncadd (!%p847_p6), %s648_s30, 4294967232  ;;  %s18_s25 = sadd.s32 1, %s1021_s25   ;;  %s1247_s22 = sld [smem:[#allocation5_spill]] }
 0x402   : > { %p15_p7 = scmp.ge.s32.totalorder %s18_s25, 10   ;;  %s1248_s6 = sld [smem:[#allocation6_spill]] }
 0x403   : > { %s1249_s24 = sld [smem:[#allocation7_spill]]  ;;  %s1250_s18 = smov %s997_s19 }
 0x404   : > { %s1251_s19 = smov %s1001_s20  ;;  %s1252_s20 = smov %s1125_s11 }
 0x405   : > { %s1253_s21 = smov %s1013_s23  ;;  %17 = sbr.rel (!%p15_p7) target bundleno = 5 (0x5), region = 87 }
 0x408   : > { %s1254_s23 = smov %s1248_s6 }
 0x40c   :  { %653 = vsyncpa [#allocation3], 1 }
 0x40d   :  { %655 = vsyncpa [#allocation3 + $0x1], 1 }

</bundles_post_ra>
